<compile_context>
chip_gen: v7x
topology: tpu7x:2x2x1
jax: 0.10.0
libtpu: 0.0.40
codegen_flags: <defaults>
</compile_context>

<pallas_src>
import jax
import jax.numpy as jnp
from jax.experimental import pallas as pl
from jax.experimental.pallas import tpu as pltpu


def _round_up(n, m):
    return ((n + m - 1) // m) * m


def _default_vmem_budget():
    # ~3/4 of physical VMEM (96 MiB on v5e/v6e, 48 MiB on v7x); safe fallback.
    try:
        cap = int(pltpu.get_tpu_info().vmem_capacity_bytes)
        return min((cap * 3) // 4, 112 * 1024 * 1024)
    except Exception:
        return 48 * 1024 * 1024


def _pick_tn(D, tn_pref):
    """Lane-dense column tile: multiple of 128 dividing D, else full D."""
    if D % 128 != 0:
        return D
    for cand in (tn_pref, 512, 256, 128):
        if cand is None:
            continue
        if 0 < cand <= D and cand % 128 == 0 and D % cand == 0:
            return cand
    return D


def _make_kernel(tn, n_col_blocks, compute_dtype):
    def kernel(x_ref, w_ref, b_ref, o_ref):
        # x_ref: (tm, D)   w_ref: (D, tn)   b_ref: (1, tn)   o_ref: (tm, tn)
        lhs = x_ref[...]
        if compute_dtype is not None and lhs.dtype != compute_dtype:
            lhs = lhs.astype(compute_dtype)           # bf16 feed to the MXU
        h = jnp.dot(lhs, w_ref[...], preferred_element_type=jnp.float32)
        h = h + b_ref[...].astype(jnp.float32)
        fn_x = jnp.maximum(h, 0.0)                    # fn(x) = relu(x @ W + b)
        # Residual slice comes from the resident LHS block (single x stream).
        if n_col_blocks == 1:
            xres = x_ref[...]
        else:
            start = pl.multiple_of(pl.program_id(1) * tn, 128)
            xres = x_ref[:, pl.ds(start, tn)]
        o_ref[...] = (xres.astype(jnp.float32) + fn_x).astype(o_ref.dtype)
    return kernel


def residual_forward(x, w, b, *, tm=512, tn=256, use_bf16_mxu=True,
                     vmem_budget_bytes=None):
    """Residual(MLPBlock) forward: x + relu(x @ w + b).

    x: (M, D) activations; w: (D, D); b: (D,)."""
    M, D = x.shape
    assert w.shape == (D, D) and b.shape == (D,)

    x_item = jnp.dtype(x.dtype).itemsize
    out_item = x_item

    compute_dtype = jnp.bfloat16 if (use_bf16_mxu and x.dtype == jnp.float32) else None
    if compute_dtype is not None and w.dtype == jnp.float32:
        w = w.astype(compute_dtype)       # one-time cast: halves W HBM traffic
    w_item = jnp.dtype(w.dtype).itemsize
    b_item = jnp.dtype(b.dtype).itemsize

    if vmem_budget_bytes is None:
        vmem_budget_bytes = _default_vmem_budget()

    # ---------------- tile selection ----------------
    tn = _pick_tn(D, tn)
    packing = max(8, 32 // x_item)        # native sublane packing per dtype
    tm = max(packing, min(tm, _round_up(M, packing)))

    def _footprint(tm_, tn_, lhs_bufs_):
        return (lhs_bufs_ * tm_ * D * x_item        # x LHS (resident across j)
                + 2 * D * tn_ * w_item              # W column tile
                + 2 * tn_ * b_item                  # bias tile
                + 2 * tm_ * tn_ * out_item)         # output tile

    lhs_bufs = 2
    while _footprint(tm, tn, lhs_bufs) > vmem_budget_bytes:
        if lhs_bufs == 2:
            # LHS block index (i, 0) is constant over j; its second buffer
            # only buys cross-row prefetch, so reclaim it first (v7x).
            lhs_bufs = 1
        elif tn % 256 == 0:
            tn //= 2                                  # stays a 128-multiple dividing D
        elif tm > packing:
            tm = max(packing, _round_up(tm // 2, packing))
        else:
            break

    n_row_blocks = (M + tm - 1) // tm                 # ragged last block is masked
    n_col_blocks = D // tn
    grid = (n_row_blocks, n_col_blocks)

    b2 = b.reshape(1, D)

    if lhs_bufs == 2:
        x_spec = pl.BlockSpec((tm, D), lambda i, j: (i, 0))
    else:
        x_spec = pl.BlockSpec((tm, D), lambda i, j: (i, 0),
                              pipeline_mode=pl.Buffered(1))

    cost = pl.CostEstimate(
        flops=2 * M * D * D + 3 * M * D,
        transcendentals=0,
        bytes_accessed=(M * D * x_item                     # LHS: once per row (elided over j)
                        + n_row_blocks * D * D * w_item    # W: re-fetched per row tile
                        + n_row_blocks * D * b_item        # bias (negligible)
                        + M * D * out_item),               # output
    )

    out = pl.pallas_call(
        _make_kernel(tn, n_col_blocks, compute_dtype),
        out_shape=jax.ShapeDtypeStruct((M, D), x.dtype),
        grid_spec=pltpu.PrefetchScalarGridSpec(
            num_scalar_prefetch=0,
            grid=grid,
            in_specs=[
                x_spec,                                        # x rows (LHS + residual)
                pl.BlockSpec((D, tn), lambda i, j: (0, j)),    # W column tile
                pl.BlockSpec((1, tn), lambda i, j: (0, j)),    # bias tile
            ],
            out_specs=pl.BlockSpec((tm, tn), lambda i, j: (i, j)),
        ),
        compiler_params=pltpu.CompilerParams(
            dimension_semantics=("parallel", "parallel"),
            vmem_limit_bytes=int(vmem_budget_bytes),
        ),
        cost_estimate=cost,
    )(x, w, b2)

    return out


if __name__ == "__main__":
    key = jax.random.PRNGKey(0)
    kx, kw, kb, kx3, kw3, kb3 = jax.random.split(key, 6)

    # Small shapes consistent with Residual(MLPBlock(hidden, hidden)).
    batch, hidden = 16, 128
    x = jax.random.normal(kx, (batch, hidden), dtype=jnp.float32)
    w = jax.random.normal(kw, (hidden, hidden), dtype=jnp.float32) * 0.05
    b = jax.random.normal(kb, (hidden,), dtype=jnp.float32) * 0.05

    # 1) Default path (bf16 MXU feed, f32 accumulation / residual).
    out = jax.block_until_ready(residual_forward(x, w, b))
    ref = x + jnp.maximum(x @ w + b, 0.0)
    assert jnp.allclose(out, ref, atol=2e-2, rtol=2e-2), "bf16-MXU path mismatch"

    # 2) Ragged batch (not a multiple of the sublane packing) + exact-f32 path:
    #    exercises masked partial row blocks with no wrapper-side padding.
    x2 = jax.random.normal(kx, (13, hidden), dtype=jnp.float32)
    out2 = jax.block_until_ready(residual_forward(x2, w, b, use_bf16_mxu=False))
    ref2 = x2 + jnp.maximum(x2 @ w + b, 0.0)
    assert jnp.allclose(out2, ref2, atol=1e-4, rtol=1e-4), "f32 path mismatch"

    # 3) Multiple column blocks: exercises the in-kernel pl.ds residual slice.
    hidden3 = 256
    x3 = jax.random.normal(kx3, (batch, hidden3), dtype=jnp.float32)
    w3 = jax.random.normal(kw3, (hidden3, hidden3), dtype=jnp.float32) * 0.05
    b3 = jax.random.normal(kb3, (hidden3,), dtype=jnp.float32) * 0.05
    out3 = jax.block_until_ready(residual_forward(x3, w3, b3, tn=128))
    ref3 = x3 + jnp.maximum(x3 @ w3 + b3, 0.0)
    assert jnp.allclose(out3, ref3, atol=2e-2, rtol=2e-2), "pl.ds residual path mismatch"

    print("KERNEL_OK")
</pallas_src>

<mosaic_0001>
module attributes {stable_mosaic.version = 11 : i64} {
  func.func @kernel(%arg0: i32, %arg1: i32, %arg2: memref<16x128xf32, #tpu.memory_space<vmem>>, %arg3: memref<128x128xbf16, #tpu.memory_space<vmem>>, %arg4: memref<1x128xf32, #tpu.memory_space<vmem>>, %arg5: memref<16x128xf32, #tpu.memory_space<vmem>>) attributes {dimension_semantics = [#tpu.dimension_semantics<parallel>, #tpu.dimension_semantics<parallel>], iteration_bounds = array<i64: 1, 1>, scalar_prefetch = 0 : i64, scratch_operands = 0 : i64, tpu.core_type = #tpu.core_type<tc>, window_params = [{transform_indices = @transform_0, window_bounds = array<i64: 16, 128>}, {transform_indices = @transform_1, window_bounds = array<i64: 128, 128>}, {transform_indices = @transform_2, window_bounds = array<i64: 1, 128>}, {transform_indices = @transform_3, window_bounds = array<i64: 16, 128>}]} {
    %c0 = arith.constant 0 : index
    %c0_0 = arith.constant 0 : index
    %0 = vector.load %arg2[%c0, %c0_0] : memref<16x128xf32, #tpu.memory_space<vmem>>, vector<16x128xf32>
    %1 = arith.truncf %0 : vector<16x128xf32> to vector<16x128xbf16>
    %c0_1 = arith.constant 0 : index
    %c0_2 = arith.constant 0 : index
    %2 = vector.load %arg3[%c0_1, %c0_2] : memref<128x128xbf16, #tpu.memory_space<vmem>>, vector<128x128xbf16>
    %cst = arith.constant dense<0.000000e+00> : vector<16x128xf32>
    %3 = tpu.matmul %1, %2, %cst {dimension_numbers = #tpu.dot_dimension_numbers<[1], [0], [0], [1], [0, 0, 1, 1], [], []>} : vector<16x128xbf16>, vector<128x128xbf16>, vector<16x128xf32> -> vector<16x128xf32>
    %c0_3 = arith.constant 0 : index
    %c0_4 = arith.constant 0 : index
    %4 = vector.load %arg4[%c0_3, %c0_4] : memref<1x128xf32, #tpu.memory_space<vmem>>, vector<1x128xf32>
    %5 = vector.broadcast %4 : vector<1x128xf32> to vector<16x128xf32>
    %6 = arith.addf %3, %5 : vector<16x128xf32>
    %cst_5 = arith.constant 0.000000e+00 : f32
    %7 = vector.broadcast %cst_5 : f32 to vector<16x128xf32>
    %8 = arith.maximumf %6, %7 : vector<16x128xf32>
    %c0_6 = arith.constant 0 : index
    %c0_7 = arith.constant 0 : index
    %9 = vector.load %arg2[%c0_6, %c0_7] : memref<16x128xf32, #tpu.memory_space<vmem>>, vector<16x128xf32>
    %10 = arith.addf %9, %8 : vector<16x128xf32>
    %c0_8 = arith.constant 0 : index
    %c0_9 = arith.constant 0 : index
    %11 = vector.load %arg5[%c0_8, %c0_9] : memref<16x128xf32, #tpu.memory_space<vmem>>, vector<16x128xf32>
    tpu.vector_store %arg5[%c0_8, %c0_9], %10 {strides = array<i32>} : memref<16x128xf32, #tpu.memory_space<vmem>>, vector<16x128xf32>,
    return
  }
  func.func @transform_0(%arg0: i32, %arg1: i32) -> (i32, i32) {
    %c0_i32 = arith.constant 0 : i32
    %c0_i32_0 = arith.constant 0 : i32
    return %arg0, %c0_i32 : i32, i32
  }
  func.func @transform_1(%arg0: i32, %arg1: i32) -> (i32, i32) {
    %c0_i32 = arith.constant 0 : i32
    %c0_i32_0 = arith.constant 0 : i32
    return %c0_i32, %arg1 : i32, i32
  }
  func.func @transform_2(%arg0: i32, %arg1: i32) -> (i32, i32) {
    %c0_i32 = arith.constant 0 : i32
    %c0_i32_0 = arith.constant 0 : i32
    return %c0_i32, %arg1 : i32, i32
  }
  func.func @transform_3(%arg0: i32, %arg1: i32) -> (i32, i32) {
    %c0_i32 = arith.constant 0 : i32
    return %arg0, %arg1 : i32, i32
  }
}

</mosaic_0001>

<bundles_post_ra>
// kernel: tpu_custom_call.1
= control target key start
LH: loop header
LB: loop body
LE: loop exit
PB: predicated region body
PF: predicated region fallthrough
CT: control target
= control target key end

     0   :  { %8 = vsyncpa [#allocation3], 0  ;;  %s384_s0 = inlined_call_operand.hbm [shape: f32[16,128], index: 0, kind: input, shape index: {}]   ;;  %s385_s1 = inlined_call_operand.hbm [shape: bf16[128,128], index: 1, kind: input, shape index: {}]   ;;  %s386_s2 = inlined_call_operand.vmem [shape: f32[1,128], index: 2, kind: input, shape index: {}]   ;;  %s387_s3 = inlined_call_operand.hbm [shape: f32[16,128], index: 3, kind: output, shape index: {}]  }
   0x1   :  { %9 = vsyncpa [#allocation6], 0 }
   0x2   :  { %10 = vsyncpa [#allocation4], 0  ;;  %s310_s12 = smov [#allocation2]   ;;  %s238_s16 = scalar_lea.hbm %s384_s0, 256 }
   0x3   :  { %s16_s13 = sshll.u32 %s310_s12, 4  ;;  %p239_p0 = scmp.ne.s32.totalorder %s384_s0, %s238_s16  ;;  %s17_s13 = int_to_ptr.vmem [resolvable:$true] %s16_s13 }
   0x4   :  { %p242_p1 = scmp.lt.u32.totalorder %s238_s16, %s384_s0 }
   0x6   :  { %p244_p2 = pnand %p242_p1, %p239_p0 }
   0x8   :  { %247 = shalt.err (!%p244_p2)
}
   0x9   :  { %s248_s21 = scalar_lea.vmem %s17_s13, 256  ;;  %p253_p4 = scmp.lt.s32.totalorder %s17_s13, %s17_s13 }
   0xa   :  { %p249_p3 = scmp.ne.s32.totalorder %s17_s13, %s248_s21  ;;  %p254_p5 = scmp.lt.s32.totalorder %s248_s21, %s248_s21 }
   0xc   :  { %p255_p6 = por %p254_p5, %p253_p4 }
   0xe   :  { %p256_p7 = pnand %p255_p6, %p249_p3 }
  0x10   :  { %259 = shalt.err (!%p256_p7)
}
  0x11   :  { %s311_s22 = smov 128   ;;  %s312_s23 = smov 8  }
  0x12   :  { %22 = dma.hbm_to_vmem [thread:$0]  %s384_s0, 256, %s17_s13, [#allocation3], %s311_s22, %s311_s22, %s312_s23  }
  0x13   :  { %s313_s26 = smov [#allocation5]   ;;  %s260_s30 = scalar_lea.hbm %s385_s1, 1024 }
  0x14   :  { %s28_s27 = sshll.u32 %s313_s26, 4  ;;  %p261_p8 = scmp.ne.s32.totalorder %s385_s1, %s260_s30  ;;  %s29_s27 = int_to_ptr.vmem [resolvable:$true] %s28_s27 }
  0x15   :  { %p264_p9 = scmp.lt.u32.totalorder %s260_s30, %s385_s1 }
  0x17   :  { %p266_p10 = pnand %p264_p9, %p261_p8 }
  0x19   :  { %269 = shalt.err (!%p266_p10)
}
  0x1a   :  { %s270_s8 = scalar_lea.vmem %s29_s27, 1024  ;;  %p275_p12 = scmp.lt.s32.totalorder %s29_s27, %s29_s27 }
  0x1b   :  { %p271_p11 = scmp.ne.s32.totalorder %s29_s27, %s270_s8  ;;  %p276_p13 = scmp.lt.s32.totalorder %s270_s8, %s270_s8 }
  0x1d   :  { %p277_p0 = por %p276_p13, %p275_p12 }
  0x1f   :  { %p278_p1 = pnand %p277_p0, %p271_p11 }
  0x21   :  { %281 = shalt.err (!%p278_p1)
}
  0x22   :  { %s314_s0 = smov 64   ;;  %s315_s9 = smov 4  }
  0x23   :  { %34 = dma.hbm_to_vmem [thread:$0]  %s385_s1, 1024, %s29_s27, [#allocation6], %s314_s0, %s314_s0, %s315_s9  }
  0x24   :  { %304 = dma.done.wait [#allocation3], 256  }
  0x25   :  { %305 = vsyncadd [#allocation3], 4294967040 }
  0x26   :  { %306 = dma.done.wait [#allocation6], 1024  }
  0x27   :  { %307 = vsyncadd [#allocation6], 4294966272  ;;  %v316_v0 = vmov 0.0   ;;  %vm317_vm0 = vmmov 0   ;;  %v230_v1 = vld [vmem:[#allocation5] sm:$0xff]   ;;  %v231_v2 = vld [vmem:[#allocation5 + $0x8] sm:$0xff]  }
  0x28   :  { %201 = vmatprep.subr.bf16.mxu0 %v316_v0  ;;  %217 = vmatprep.mubr.msk.bf16.mxu0 %vm317_vm0, %v316_v0  ;;  %v232_v3 = vld [vmem:[#allocation5 + $0x10] sm:$0xff]   ;;  %v233_v4 = vld [vmem:[#allocation5 + $0x18] sm:$0xff]   ;;  %v234_v5 = vld [vmem:[#allocation5 + $0x20] sm:$0xff]   ;;  %s318_s13 = smov [#allocation7]  }
  0x29   :  { %202 = vmatpush3.bf16.msra.mxu0 %v230_v1  ;;  %v235_v6 = vld [vmem:[#allocation5 + $0x28] sm:$0xff]   ;;  %v236_v7 = vld [vmem:[#allocation5 + $0x30] sm:$0xff]   ;;  %v237_v8 = vld [vmem:[#allocation5 + $0x38] sm:$0xff]   ;;  %s170_s14 = sshll.u32 %s318_s13, 4  ;;  %s171_s14 = int_to_ptr.vmem [resolvable:$true] %s170_s14 }
  0x2a   :  { %203 = vmatprep.subr.bf16.mxu0 %v316_v0  ;;  %v44_v9 = vld [vmem:[#allocation2] sm:$0xff]  ;;  %v45_v10 = vld [vmem:[#allocation2 + $0x8] sm:$0xff]  ;;  %s282_s15 = scalar_lea.vmem %s171_s14, 256  ;;  %p287_p3 = scmp.lt.s32.totalorder %s171_s14, %s171_s14 }
  0x2b   :  { %v46_v11 = vpack.c.bf16 %v45_v10, %v44_v9  ;;  %v183_v12 = vld [vmem:[%s386_s2] ss:$0 sm:$0xff]  ;;  %p283_p2 = scmp.ne.s32.totalorder %s171_s14, %s282_s15  ;;  %p288_p4 = scmp.lt.s32.totalorder %s282_s15, %s282_s15 }
  0x2d   :  { %204 = vmatpush3.bf16.msra.mxu0 %v231_v2  ;;  %p289_p5 = por %p288_p4, %p287_p3 }
  0x2e   :  { %205 = vmatprep.subr.bf16.mxu0 %v316_v0 }
  0x2f   :  { %p290_p6 = pnand %p289_p5, %p283_p2 }
  0x31   :  { %206 = vmatpush3.bf16.msra.mxu0 %v232_v3 }
  0x32   :  { %207 = vmatprep.subr.bf16.mxu0 %v316_v0 }
  0x35   :  { %208 = vmatpush3.bf16.msra.mxu0 %v233_v4 }
  0x36   :  { %209 = vmatprep.subr.bf16.mxu0 %v316_v0 }
  0x39   :  { %210 = vmatpush3.bf16.msra.mxu0 %v234_v5 }
  0x3a   :  { %211 = vmatprep.subr.bf16.mxu0 %v316_v0 }
  0x3d   :  { %212 = vmatpush3.bf16.msra.mxu0 %v235_v6 }
  0x3e   :  { %213 = vmatprep.subr.bf16.mxu0 %v316_v0 }
  0x41   :  { %214 = vmatpush3.bf16.msra.mxu0 %v236_v7 }
  0x42   :  { %215 = vmatprep.subr.bf16.mxu0 %v316_v0 }
  0x45   :  { %216 = vmatpush3.bf16.msra.mxu0 %v237_v8 }
  0x48   :  { %218 = vmatmul.mubr.bf16.vlgmr.msra.gmra.mrb[0].mxu0 %v46_v11 }
 0x11b   :  { %v152_v13 = vpop.f32.mrb[0].mxu0 }
 0x11c   :  { %v153_v14 = vadd.f32 %v183_v12, %v152_v13  ;;  %v219_v15 = vpop.f32.mrb[1].mxu0 }
 0x11d   :  { %v155_v16 = vpop.f32.mrb[2].mxu0 }
 0x11e   :  { %v159_v17 = vmax.f32 %v153_v14, 0.0  ;;  %v156_v18 = vadd.f32 %v183_v12, %v155_v16  ;;  %v220_v19 = vpop.f32.mrb[3].mxu0 }
 0x120   :  { %v161_v20 = vadd.f32 %v159_v17, %v44_v9  ;;  %v160_v21 = vmax.f32 %v156_v18, 0.0 }
 0x122   :  { %163 = vst [vmem:[#allocation7] sm:$0xff] %v161_v20  ;;  %v162_v22 = vadd.f32 %v160_v21, %v45_v10 }
 0x124   :  { %164 = vst [vmem:[#allocation7 + $0x8] sm:$0xff] %v162_v22 }
 0x125   :  { %293 = shalt.err (!%p290_p6)
}
 0x126   :  { %s294_s17 = scalar_lea.hbm %s387_s3, 256 }
 0x127   :  { %p295_p7 = scmp.ne.s32.totalorder %s387_s3, %s294_s17  ;;  %p298_p8 = scmp.lt.u32.totalorder %s294_s17, %s387_s3 }
 0x129   :  { %p300_p9 = pnand %p298_p8, %p295_p7 }
 0x12b   :  { %303 = shalt.err (!%p300_p9)
}
 0x12c   :  { %176 = dma.vmem_to_hbm [thread:$0]  %s171_s14, 256, %s387_s3, [#allocation4], %s311_s22, %s311_s22, %s312_s23  }
 0x12d   :  { %308 = dma.done.wait [#allocation4], 256  }
 0x12e   :  { %309 = vsyncadd [#allocation4], 4294967040 }
 0x12f   :  { %180 = vsyncpa [#allocation3], 1 }
 0x130   :  { %181 = vsyncpa [#allocation6], 1 }
 0x131   :  { %182 = vsyncpa [#allocation4], 1 }

</bundles_post_ra>
